<compile_context>
chip_gen: v6e
topology: v6e:2x2x1
jax: 0.10.0
libtpu: 0.0.40
codegen_flags: <defaults>
</compile_context>

<pallas_src>
import functools

import numpy as np

import jax
import jax.numpy as jnp
from jax import lax
from jax.experimental import pallas as pl
from jax.experimental.pallas import tpu as pltpu

LANES = 128
ACC_ROWS = 8          # per-core partial-sum accumulator: one (8, 128) f32 vreg
MAX_TILE_ROWS = 1024  # (1024, 128) f32 tile = 512 KiB / input / buffer


def _round_up(x, m):
    return ((x + m - 1) // m) * m


def _mse_kernel(s_ref, t_ref, o_ref, *, tile_rows, steps, total_rows, needs_mask):
    # s_ref, t_ref: (tile_rows, 128) tiles in VMEM (original input dtype)
    # o_ref:        (8, 128) f32 per-core partial-sum block, resident across
    #               the reduction axis (same output block index for all steps).
    c = pl.program_id(0)   # "parallel" axis (TensorCore split on v7x)
    i = pl.program_id(1)   # "arbitrary" reduction axis

    @pl.when(i == 0)
    def _():
        o_ref[...] = jnp.zeros_like(o_ref)

    # Upcast in-kernel (keeps the DMA in the narrow input dtype).
    d = s_ref[...].astype(jnp.float32) - t_ref[...].astype(jnp.float32)

    if needs_mask:
        # Zero out rows beyond the valid extent (partial edge block and/or
        # clamped overflow block of the core split).  Cheap VPU work, fully
        # hidden under the DMA.
        row0 = (c * steps + i) * tile_rows
        rid = row0 + lax.broadcasted_iota(jnp.int32, (tile_rows, 1), 0)
        d = jnp.where(rid < total_rows, d, 0.0)

    sq = d * d
    # Per-(sublane, lane) partial sums: elementwise vreg adds only; the
    # expensive cross-lane/cross-sublane reduce is deferred to the wrapper.
    o_ref[...] += sq.reshape(tile_rows // ACC_ROWS, ACC_ROWS, LANES).sum(axis=0)


@jax.jit
def l2_loss(student_output, teacher_output):
    """Pallas equivalent of L2Loss.forward: mean((student - teacher) ** 2)."""
    assert student_output.shape == teacher_output.shape
    n_elems = student_output.size

    # Keep the narrow dtype all the way into the kernel (bf16/f16 stream at
    # half the bytes); anything exotic falls back to f32.
    dt = np.dtype(jnp.promote_types(student_output.dtype, teacher_output.dtype))
    if dt not in (np.dtype(jnp.float32), np.dtype(jnp.bfloat16), np.dtype(jnp.float16)):
        dt = np.dtype(jnp.float32)
    s = jnp.ravel(student_output).astype(dt)
    t = jnp.ravel(teacher_output).astype(dt)

    # Sublane packing multiple for the second-minor tile dim.
    sub_mult = {4: 8, 2: 16, 1: 32}.get(dt.itemsize, 8)

    # Lane-dense (rows, 128) view.  Pad only up to the next sublane-multiple
    # of 128 lanes (zeros contribute 0 to the sum); no padding at all when
    # the size is already aligned.
    rows = _round_up(pl.cdiv(n_elems, LANES), sub_mult)
    padded = rows * LANES
    if padded != n_elems:
        s = jnp.pad(s, (0, padded - n_elems))
        t = jnp.pad(t, (0, padded - n_elems))
    s = s.reshape(rows, LANES)
    t = t.reshape(rows, LANES)

    # Tiling: biggest row tile up to 1024 (memory-bound kernel; large DMAs
    # amortize the ~0.35us per-grid-step overhead).
    tile_rows = min(MAX_TILE_ROWS, rows)        # multiple of sub_mult (and 8)
    num_blocks = pl.cdiv(rows, tile_rows)
    ncores = 2 if num_blocks > 1 else 1         # v7x megacore split; harmless on 1-TC chips
    steps = pl.cdiv(num_blocks, ncores)
    needs_mask = (ncores * steps * tile_rows) != rows

    def in_index_map(c, i):
        blk = c * steps + i
        if ncores * steps != num_blocks:
            # Overflow step of the last core re-reads the final valid block;
            # its contribution is masked to zero inside the kernel.
            blk = jnp.minimum(blk, num_blocks - 1)
        return (blk, 0)

    kernel = functools.partial(
        _mse_kernel,
        tile_rows=tile_rows,
        steps=steps,
        total_rows=rows,
        needs_mask=needs_mask,
    )

    partials = pl.pallas_call(
        kernel,
        out_shape=jax.ShapeDtypeStruct((ncores * ACC_ROWS, LANES), jnp.float32),
        grid_spec=pltpu.PrefetchScalarGridSpec(
            num_scalar_prefetch=0,
            grid=(ncores, steps),
            in_specs=[
                pl.BlockSpec((tile_rows, LANES), in_index_map),
                pl.BlockSpec((tile_rows, LANES), in_index_map),
            ],
            out_specs=pl.BlockSpec((ACC_ROWS, LANES), lambda c, i: (c, 0)),
        ),
        compiler_params=pltpu.CompilerParams(
            dimension_semantics=("parallel", "arbitrary"),
        ),
    )(s, t)

    # Tiny final reduce over (ncores*8, 128) partials; mean over the *true*
    # element count (padding / masked rows contributed exactly zero).
    return jnp.sum(partials) / jnp.float32(n_elems)


if __name__ == "__main__":
    key = jax.random.PRNGKey(0)
    ks = jax.random.split(key, 6)

    # Primary small case consistent with the module: NCHW feature maps.
    shape = (2, 4, 16, 16)
    student = jax.random.normal(ks[0], shape, dtype=jnp.float32)
    teacher = jax.random.normal(ks[1], shape, dtype=jnp.float32)
    loss = l2_loss(student, teacher)
    jax.block_until_ready(loss)
    ref = jnp.mean((student - teacher) ** 2)
    assert jnp.allclose(loss, ref, rtol=1e-6, atol=1e-6), (loss, ref)

    # Non-128-aligned element count (exercises the small tail pad).
    shape2 = (2, 3, 17, 13)
    s2 = jax.random.normal(ks[2], shape2, dtype=jnp.float32)
    t2 = jax.random.normal(ks[3], shape2, dtype=jnp.float32)
    l2 = l2_loss(s2, t2)
    r2 = jnp.mean((s2 - t2) ** 2)
    assert jnp.allclose(l2, r2, rtol=1e-6, atol=1e-6), (l2, r2)

    # Multi-tile / two-core split with a ragged row tail (in-kernel mask) and
    # native bf16 streaming (upcast to f32 inside the kernel).
    shape3 = (3, 8, 80, 80)   # 153600 elems -> 1200 rows -> 2 row tiles
    s3 = jax.random.normal(ks[4], shape3, dtype=jnp.bfloat16)
    t3 = jax.random.normal(ks[5], shape3, dtype=jnp.bfloat16)
    l3 = l2_loss(s3, t3)
    r3 = jnp.mean((s3.astype(jnp.float32) - t3.astype(jnp.float32)) ** 2)
    assert jnp.allclose(l3, r3, rtol=1e-5, atol=1e-6), (l3, r3)

    print("KERNEL_OK")
</pallas_src>

<mosaic_0001>
module attributes {stable_mosaic.version = 11 : i64} {
  func.func @_mse_kernel(%arg0: i32, %arg1: i32, %arg2: memref<16x128xf32, #tpu.memory_space<vmem>>, %arg3: memref<16x128xf32, #tpu.memory_space<vmem>>, %arg4: memref<8x128xf32, #tpu.memory_space<vmem>>) attributes {dimension_semantics = [#tpu.dimension_semantics<parallel>, #tpu.dimension_semantics<arbitrary>], iteration_bounds = array<i64: 1, 1>, scalar_prefetch = 0 : i64, scratch_operands = 0 : i64, tpu.core_type = #tpu.core_type<tc>, window_params = [{transform_indices = @transform_0, window_bounds = array<i64: 16, 128>}, {transform_indices = @transform_1, window_bounds = array<i64: 16, 128>}, {transform_indices = @transform_2, window_bounds = array<i64: 8, 128>}]} {
    %c0_i32 = arith.constant 0 : i32
    %0 = arith.cmpi eq, %arg1, %c0_i32 : i32
    %1 = arith.extui %0 : i1 to i32
    %c0_i32_0 = arith.constant 0 : i32
    %2 = arith.cmpi ne, %1, %c0_i32_0 : i32
    scf.if %2 {
      %cst_8 = arith.constant 0.000000e+00 : f32
      %12 = vector.broadcast %cst_8 : f32 to vector<8x128xf32>
      %c0_9 = arith.constant 0 : index
      %c0_10 = arith.constant 0 : index
      %13 = vector.load %arg4[%c0_9, %c0_10] : memref<8x128xf32, #tpu.memory_space<vmem>>, vector<8x128xf32>
      tpu.vector_store %arg4[%c0_9, %c0_10], %12 {strides = array<i32>} : memref<8x128xf32, #tpu.memory_space<vmem>>, vector<8x128xf32>,
    } else {
    }
    %c0 = arith.constant 0 : index
    %c0_1 = arith.constant 0 : index
    %3 = vector.load %arg2[%c0, %c0_1] : memref<16x128xf32, #tpu.memory_space<vmem>>, vector<16x128xf32>
    %c0_2 = arith.constant 0 : index
    %c0_3 = arith.constant 0 : index
    %4 = vector.load %arg3[%c0_2, %c0_3] : memref<16x128xf32, #tpu.memory_space<vmem>>, vector<16x128xf32>
    %5 = arith.subf %3, %4 : vector<16x128xf32>
    %6 = arith.mulf %5, %5 : vector<16x128xf32>
    %c0_4 = arith.constant 0 : index
    %c0_5 = arith.constant 0 : index
    %7 = vector.load %arg4[%c0_4, %c0_5] : memref<8x128xf32, #tpu.memory_space<vmem>>, vector<8x128xf32>
    %8 = vector.shape_cast %6 : vector<16x128xf32> to vector<2x8x128xf32>
    %cst = arith.constant dense<0.000000e+00> : vector<8x128xf32>
    %9 = vector.multi_reduction <add>, %8, %cst [0] : vector<2x8x128xf32> to vector<8x128xf32>
    %10 = arith.addf %7, %9 : vector<8x128xf32>
    %c0_6 = arith.constant 0 : index
    %c0_7 = arith.constant 0 : index
    %11 = vector.load %arg4[%c0_6, %c0_7] : memref<8x128xf32, #tpu.memory_space<vmem>>, vector<8x128xf32>
    tpu.vector_store %arg4[%c0_6, %c0_7], %10 {strides = array<i32>} : memref<8x128xf32, #tpu.memory_space<vmem>>, vector<8x128xf32>,
    return
  }
  func.func @transform_0(%arg0: i32, %arg1: i32) -> (i32, i32) {
    %c1_i32 = arith.constant 1 : i32
    %0 = arith.muli %arg0, %c1_i32 : i32
    %1 = arith.addi %0, %arg1 : i32
    %c0_i32 = arith.constant 0 : i32
    %c0_i32_0 = arith.constant 0 : i32
    return %1, %c0_i32 : i32, i32
  }
  func.func @transform_1(%arg0: i32, %arg1: i32) -> (i32, i32) {
    %c1_i32 = arith.constant 1 : i32
    %0 = arith.muli %arg0, %c1_i32 : i32
    %1 = arith.addi %0, %arg1 : i32
    %c0_i32 = arith.constant 0 : i32
    %c0_i32_0 = arith.constant 0 : i32
    return %1, %c0_i32 : i32, i32
  }
  func.func @transform_2(%arg0: i32, %arg1: i32) -> (i32, i32) {
    %c0_i32 = arith.constant 0 : i32
    %c0_i32_0 = arith.constant 0 : i32
    return %arg0, %c0_i32 : i32, i32
  }
}

</mosaic_0001>

<bundles_post_ra>
// kernel: l2_loss.1
= control target key start
LH: loop header
LB: loop body
LE: loop exit
PB: predicated region body
PF: predicated region fallthrough
CT: control target
= control target key end

     0   :  { %s119_s0 = inlined_call_operand.vmem [shape: f32[16,128], index: 0, kind: input, shape index: {}]   ;;  %s120_s1 = inlined_call_operand.vmem [shape: f32[16,128], index: 1, kind: input, shape index: {}]   ;;  %s121_s2 = inlined_call_operand.vmem [shape: f32[8,128], index: 2, kind: output, shape index: {}]  }
   0x1   :  { %v60_v0 = vld [vmem:[%s119_s0] sm:$0xff]  ;;  %v61_v1 = vld [vmem:[%s119_s0 + $0x8] sm:$0xff] }
   0x2   :  { %v62_v2 = vld [vmem:[%s120_s1] sm:$0xff]  ;;  %v63_v3 = vld [vmem:[%s120_s1 + $0x8] sm:$0xff] }
   0x3   :  { %v64_v4 = vsub.f32 %v60_v0, %v62_v2  ;;  %v65_v5 = vsub.f32 %v61_v1, %v63_v3 }
   0x5   :  { %v66_v6 = vmul.f32 %v64_v4, %v64_v4  ;;  %v67_v7 = vmul.f32 %v65_v5, %v65_v5 }
   0x7   :  { %v69_v8 = vadd.f32 %v67_v7, %v66_v6 }
   0x9   :  { %71 = vst [vmem:[%s121_s2] sm:$0xff] %v69_v8 }

</bundles_post_ra>
